<compile_context>
chip_gen: v7x
topology: tpu7x:2x2x1
jax: 0.10.0
libtpu: 0.0.40
codegen_flags: <defaults>
</compile_context>

<pallas_src>
import jax
import jax.numpy as jnp
from jax import lax
from jax.experimental import pallas as pl
from jax.experimental.pallas import tpu as pltpu

_LANES = 128  # TPU vreg lane width; gram outputs are padded to this.


# ----------------------------------------------------------------------------
# Fused kernel: (linear backbone -> Gram -> diag rescale) x 2, center, CKA.
# ----------------------------------------------------------------------------
def _cka_fused_kernel(xs_ref, ws_ref, xt_ref, wt_ref,
                      gram_s_ref, gram_t_ref, loss_ref):
    def gram(x, w):
        # Backbone feature (MXU), f32 accumulation.
        feat = jnp.dot(x, w, preferred_element_type=jnp.float32)
        # Raw Gram in one MXU pass, contracting last dims of both operands.
        g_raw = lax.dot_general(
            feat, feat,
            dimension_numbers=(((1,), (1,)), ((), ())),
            preferred_element_type=jnp.float32)
        n = g_raw.shape[0]
        # diag(G_raw) == row ||feat||^2 : n-wide masked lane reduce instead of
        # a hid-wide reduce + full-width feature rescale.
        ri = lax.broadcasted_iota(jnp.int32, (n, n), 0)
        ci = lax.broadcasted_iota(jnp.int32, (n, n), 1)
        d = jnp.sum(jnp.where(ri == ci, g_raw, 0.0), axis=1, keepdims=True)
        # F.normalize clamp: 1/max(||f||, 1e-12) == rsqrt(max(||f||^2, 1e-24)).
        s = lax.rsqrt(jnp.maximum(d, 1e-24))          # (n, 1), EUP slot
        return g_raw * (s * s.T)                      # diagonal rescale

    gx = gram(xs_ref[...], ws_ref[...])
    gy = gram(xt_ref[...], wt_ref[...])

    # Lane-dense stores: write full (bsz, 128) slabs (unmasked vst + dense
    # writeback); wrapper slices back to (bsz, bsz).
    n = gx.shape[0]
    pad = jnp.zeros((n, _LANES - n), jnp.float32)
    gram_s_ref[...] = jnp.concatenate([gx, pad], axis=1)
    gram_t_ref[...] = jnp.concatenate([gy, pad], axis=1)

    # center_gram (biased branch):
    #   means = mean(gram, dim=0); means -= mean(means)/2
    #   gram  = gram - means[:, None] - means[None, :]
    # TODO(synk): PyTorch computes the centering means in float64; the TPU VPU
    # is f32-only, so the means are f32 here (fine at small bsz).
    def center(g):
        m = jnp.mean(g, axis=0)
        m = m - jnp.mean(m) / 2.0
        return g - m[:, None] - m[None, :]

    cgx = center(gx)
    cgy = center(gy)

    scaled_hsic = jnp.sum(cgx * cgy)       # ravel().dot(ravel())
    ss_x = jnp.sum(cgx * cgx)              # ||cgx||_F^2
    ss_y = jnp.sum(cgy * cgy)              # ||cgy||_F^2
    # -hsic / (||cgx|| * ||cgy||) == -hsic * rsqrt(ss_x * ss_y)
    loss_ref[0] = -(scaled_hsic * lax.rsqrt(ss_x * ss_y))


def cka_loss(x_stu, x_tch, w_stu, w_tch):
    """Returns (-cka, gram_stu, gram_tch), matching CKALoss.forward."""
    bsz = x_stu.shape[0]
    assert bsz <= _LANES, "demo-scale single-block kernel: bsz must be <= 128"
    vmem = pl.BlockSpec(memory_space=pltpu.MemorySpace.VMEM)
    smem = pl.BlockSpec(memory_space=pltpu.MemorySpace.SMEM)
    gram_s_pad, gram_t_pad, neg_loss = pl.pallas_call(
        _cka_fused_kernel,
        out_shape=(
            jax.ShapeDtypeStruct((bsz, _LANES), jnp.float32),
            jax.ShapeDtypeStruct((bsz, _LANES), jnp.float32),
            jax.ShapeDtypeStruct((1,), jnp.float32),
        ),
        in_specs=[vmem, vmem, vmem, vmem],
        out_specs=(vmem, vmem, smem),
    )(x_stu, w_stu, x_tch, w_tch)
    # Slice back to the (bsz, bsz) grams the module returns (layout plumbing).
    return neg_loss[0], gram_s_pad[:, :bsz], gram_t_pad[:, :bsz]


if __name__ == "__main__":
    # Small but lane-dense shapes: batch=8, features / hidden dims = 128.
    bsz, in_dim, hid_stu, hid_tch = 8, 128, 128, 128

    key = jax.random.PRNGKey(0)
    k_xs, k_xt, k_ws, k_wt = jax.random.split(key, 4)

    x_stu = jax.random.normal(k_xs, (bsz, in_dim), dtype=jnp.float32)
    x_tch = jax.random.normal(k_xt, (bsz, in_dim), dtype=jnp.float32)
    # Deterministic synthetic backbone weights (linear student / teacher heads).
    w_stu = jax.random.normal(k_ws, (in_dim, hid_stu), dtype=jnp.float32) * 0.1
    w_tch = jax.random.normal(k_wt, (in_dim, hid_tch), dtype=jnp.float32) * 0.1

    neg_loss, gram_stu, gram_tch = cka_loss(x_stu, x_tch, w_stu, w_tch)
    jax.block_until_ready((neg_loss, gram_stu, gram_tch))

    # Lightweight sanity check against a pure-JAX reference.
    def ref_gram(x, w):
        f = x @ w
        z = f / jnp.maximum(jnp.linalg.norm(f, axis=1, keepdims=True), 1e-12)
        return z @ z.T

    def ref_center(g):
        m = jnp.mean(g, axis=0)
        m = m - jnp.mean(m) / 2.0
        return g - m[:, None] - m[None, :]

    gx, gy = ref_gram(x_stu, w_stu), ref_gram(x_tch, w_tch)
    cgx, cgy = ref_center(gx), ref_center(gy)
    ref_neg = -(jnp.sum(cgx * cgy) /
                (jnp.linalg.norm(cgx) * jnp.linalg.norm(cgy)))

    assert jnp.allclose(gram_stu, gx, atol=2e-5), "gram_stu mismatch"
    assert jnp.allclose(gram_tch, gy, atol=2e-5), "gram_tch mismatch"
    assert jnp.allclose(neg_loss, ref_neg, atol=2e-5), "loss mismatch"

    print("KERNEL_OK")
</pallas_src>

<mosaic_0001>
module attributes {stable_mosaic.version = 11 : i64} {
  func.func @_cka_fused_kernel(%arg0: memref<8x128xf32, #tpu.memory_space<vmem>>, %arg1: memref<128x128xf32, #tpu.memory_space<vmem>>, %arg2: memref<8x128xf32, #tpu.memory_space<vmem>>, %arg3: memref<128x128xf32, #tpu.memory_space<vmem>>, %arg4: memref<8x128xf32, #tpu.memory_space<vmem>>, %arg5: memref<8x128xf32, #tpu.memory_space<vmem>>, %arg6: memref<1xf32, #tpu.memory_space<smem>>) attributes {dimension_semantics = [], scalar_prefetch = 0 : i64, scratch_operands = 0 : i64, tpu.core_type = #tpu.core_type<tc>} {
    %c0 = arith.constant 0 : index
    %c0_0 = arith.constant 0 : index
    %0 = vector.load %arg0[%c0, %c0_0] : memref<8x128xf32, #tpu.memory_space<vmem>>, vector<8x128xf32>
    %c0_1 = arith.constant 0 : index
    %c0_2 = arith.constant 0 : index
    %1 = vector.load %arg1[%c0_1, %c0_2] : memref<128x128xf32, #tpu.memory_space<vmem>>, vector<128x128xf32>
    %cst = arith.constant dense<0.000000e+00> : vector<8x128xf32>
    %2 = tpu.matmul %0, %1, %cst {dimension_numbers = #tpu.dot_dimension_numbers<[1], [0], [0], [1], [0, 0, 1, 1], [], []>} : vector<8x128xf32>, vector<128x128xf32>, vector<8x128xf32> -> vector<8x128xf32>
    %cst_3 = arith.constant dense<0.000000e+00> : vector<8x8xf32>
    %3 = tpu.matmul %2, %2, %cst_3 {dimension_numbers = #tpu.dot_dimension_numbers<[1], [1], [0], [0], [0, 0, 1, 0], [], []>} : vector<8x128xf32>, vector<8x128xf32>, vector<8x8xf32> -> vector<8x8xf32>
    %4 = tpu.iota {dimensions = array<i32: 0>} : vector<8x8xi32>
    %5 = tpu.iota {dimensions = array<i32: 1>} : vector<8x8xi32>
    %6 = arith.cmpi eq, %4, %5 : vector<8x8xi32>
    %cst_4 = arith.constant 0.000000e+00 : f32
    %7 = vector.broadcast %cst_4 : f32 to vector<8x8xf32>
    %8 = arith.select %6, %3, %7 : vector<8x8xi1>, vector<8x8xf32>
    %cst_5 = arith.constant dense<0.000000e+00> : vector<8xf32>
    %9 = vector.multi_reduction <add>, %8, %cst_5 [1] : vector<8x8xf32> to vector<8xf32>
    %10 = vector.shape_cast %9 : vector<8xf32> to vector<8x1xf32>
    %cst_6 = arith.constant 1.000000e-24 : f32
    %11 = vector.broadcast %cst_6 : f32 to vector<8x1xf32>
    %12 = arith.maximumf %10, %11 : vector<8x1xf32>
    %13 = math.rsqrt %12 : vector<8x1xf32>
    %14 = tpu.transpose %13, [1, 0] : vector<8x1xf32> -> vector<1x8xf32>
    %15 = vector.broadcast %13 : vector<8x1xf32> to vector<8x8xf32>
    %16 = vector.broadcast %14 : vector<1x8xf32> to vector<8x8xf32>
    %17 = arith.mulf %15, %16 : vector<8x8xf32>
    %18 = arith.mulf %3, %17 : vector<8x8xf32>
    %c0_7 = arith.constant 0 : index
    %c0_8 = arith.constant 0 : index
    %19 = vector.load %arg2[%c0_7, %c0_8] : memref<8x128xf32, #tpu.memory_space<vmem>>, vector<8x128xf32>
    %c0_9 = arith.constant 0 : index
    %c0_10 = arith.constant 0 : index
    %20 = vector.load %arg3[%c0_9, %c0_10] : memref<128x128xf32, #tpu.memory_space<vmem>>, vector<128x128xf32>
    %cst_11 = arith.constant dense<0.000000e+00> : vector<8x128xf32>
    %21 = tpu.matmul %19, %20, %cst_11 {dimension_numbers = #tpu.dot_dimension_numbers<[1], [0], [0], [1], [0, 0, 1, 1], [], []>} : vector<8x128xf32>, vector<128x128xf32>, vector<8x128xf32> -> vector<8x128xf32>
    %cst_12 = arith.constant dense<0.000000e+00> : vector<8x8xf32>
    %22 = tpu.matmul %21, %21, %cst_12 {dimension_numbers = #tpu.dot_dimension_numbers<[1], [1], [0], [0], [0, 0, 1, 0], [], []>} : vector<8x128xf32>, vector<8x128xf32>, vector<8x8xf32> -> vector<8x8xf32>
    %23 = tpu.iota {dimensions = array<i32: 0>} : vector<8x8xi32>
    %24 = tpu.iota {dimensions = array<i32: 1>} : vector<8x8xi32>
    %25 = arith.cmpi eq, %23, %24 : vector<8x8xi32>
    %cst_13 = arith.constant 0.000000e+00 : f32
    %26 = vector.broadcast %cst_13 : f32 to vector<8x8xf32>
    %27 = arith.select %25, %22, %26 : vector<8x8xi1>, vector<8x8xf32>
    %cst_14 = arith.constant dense<0.000000e+00> : vector<8xf32>
    %28 = vector.multi_reduction <add>, %27, %cst_14 [1] : vector<8x8xf32> to vector<8xf32>
    %29 = vector.shape_cast %28 : vector<8xf32> to vector<8x1xf32>
    %cst_15 = arith.constant 1.000000e-24 : f32
    %30 = vector.broadcast %cst_15 : f32 to vector<8x1xf32>
    %31 = arith.maximumf %29, %30 : vector<8x1xf32>
    %32 = math.rsqrt %31 : vector<8x1xf32>
    %33 = tpu.transpose %32, [1, 0] : vector<8x1xf32> -> vector<1x8xf32>
    %34 = vector.broadcast %32 : vector<8x1xf32> to vector<8x8xf32>
    %35 = vector.broadcast %33 : vector<1x8xf32> to vector<8x8xf32>
    %36 = arith.mulf %34, %35 : vector<8x8xf32>
    %37 = arith.mulf %22, %36 : vector<8x8xf32>
    %cst_16 = arith.constant 0.000000e+00 : f32
    %38 = vector.broadcast %cst_16 : f32 to vector<8x120xf32>
    %39 = tpu.concatenate %18, %38 in 1 : vector<8x8xf32>, vector<8x120xf32> -> vector<8x128xf32>
    %c0_17 = arith.constant 0 : index
    %c0_18 = arith.constant 0 : index
    %40 = vector.load %arg4[%c0_17, %c0_18] : memref<8x128xf32, #tpu.memory_space<vmem>>, vector<8x128xf32>
    tpu.vector_store %arg4[%c0_17, %c0_18], %39 {strides = array<i32>} : memref<8x128xf32, #tpu.memory_space<vmem>>, vector<8x128xf32>,
    %41 = tpu.concatenate %37, %38 in 1 : vector<8x8xf32>, vector<8x120xf32> -> vector<8x128xf32>
    %c0_19 = arith.constant 0 : index
    %c0_20 = arith.constant 0 : index
    %42 = vector.load %arg5[%c0_19, %c0_20] : memref<8x128xf32, #tpu.memory_space<vmem>>, vector<8x128xf32>
    tpu.vector_store %arg5[%c0_19, %c0_20], %41 {strides = array<i32>} : memref<8x128xf32, #tpu.memory_space<vmem>>, vector<8x128xf32>,
    %cst_21 = arith.constant dense<0.000000e+00> : vector<8xf32>
    %43 = vector.multi_reduction <add>, %18, %cst_21 [0] : vector<8x8xf32> to vector<8xf32>
    %cst_22 = arith.constant 8.000000e+00 : f32
    %44 = vector.broadcast %cst_22 : f32 to vector<8xf32>
    %45 = arith.divf %43, %44 : vector<8xf32>
    %46 = vector.shape_cast %45 : vector<8xf32> to vector<1x8xf32>
    %cst_23 = arith.constant dense<0.000000e+00> : vector<1xf32>
    %47 = vector.multi_reduction <add>, %46, %cst_23 [1] : vector<1x8xf32> to vector<1xf32>
    %48 = vector.shape_cast %47 : vector<1xf32> to vector<1x1xf32>
    %49 = vector.extract %48[0, 0] : f32 from vector<1x1xf32>
    %cst_24 = arith.constant 8.000000e+00 : f32
    %50 = arith.divf %49, %cst_24 : f32
    %cst_25 = arith.constant 2.000000e+00 : f32
    %51 = arith.divf %50, %cst_25 : f32
    %52 = vector.broadcast %51 : f32 to vector<8xf32>
    %53 = arith.subf %45, %52 : vector<8xf32>
    %54 = vector.shape_cast %53 : vector<8xf32> to vector<8x1xf32>
    %55 = vector.broadcast %54 : vector<8x1xf32> to vector<8x8xf32>
    %56 = arith.subf %18, %55 : vector<8x8xf32>
    %57 = vector.shape_cast %53 : vector<8xf32> to vector<1x8xf32>
    %58 = vector.broadcast %57 : vector<1x8xf32> to vector<8x8xf32>
    %59 = arith.subf %56, %58 : vector<8x8xf32>
    %cst_26 = arith.constant dense<0.000000e+00> : vector<8xf32>
    %60 = vector.multi_reduction <add>, %37, %cst_26 [0] : vector<8x8xf32> to vector<8xf32>
    %cst_27 = arith.constant 8.000000e+00 : f32
    %61 = vector.broadcast %cst_27 : f32 to vector<8xf32>
    %62 = arith.divf %60, %61 : vector<8xf32>
    %63 = vector.shape_cast %62 : vector<8xf32> to vector<1x8xf32>
    %cst_28 = arith.constant dense<0.000000e+00> : vector<1xf32>
    %64 = vector.multi_reduction <add>, %63, %cst_28 [1] : vector<1x8xf32> to vector<1xf32>
    %65 = vector.shape_cast %64 : vector<1xf32> to vector<1x1xf32>
    %66 = vector.extract %65[0, 0] : f32 from vector<1x1xf32>
    %cst_29 = arith.constant 8.000000e+00 : f32
    %67 = arith.divf %66, %cst_29 : f32
    %cst_30 = arith.constant 2.000000e+00 : f32
    %68 = arith.divf %67, %cst_30 : f32
    %69 = vector.broadcast %68 : f32 to vector<8xf32>
    %70 = arith.subf %62, %69 : vector<8xf32>
    %71 = vector.shape_cast %70 : vector<8xf32> to vector<8x1xf32>
    %72 = vector.broadcast %71 : vector<8x1xf32> to vector<8x8xf32>
    %73 = arith.subf %37, %72 : vector<8x8xf32>
    %74 = vector.shape_cast %70 : vector<8xf32> to vector<1x8xf32>
    %75 = vector.broadcast %74 : vector<1x8xf32> to vector<8x8xf32>
    %76 = arith.subf %73, %75 : vector<8x8xf32>
    %77 = arith.mulf %59, %76 : vector<8x8xf32>
    %78 = vector.shape_cast %77 : vector<8x8xf32> to vector<1x8x8xf32>
    %cst_31 = arith.constant dense<0.000000e+00> : vector<1xf32>
    %79 = vector.multi_reduction <add>, %78, %cst_31 [1, 2] : vector<1x8x8xf32> to vector<1xf32>
    %80 = vector.shape_cast %79 : vector<1xf32> to vector<1x1x1xf32>
    %81 = vector.extract %80[0, 0, 0] : f32 from vector<1x1x1xf32>
    %82 = arith.mulf %59, %59 : vector<8x8xf32>
    %83 = vector.shape_cast %82 : vector<8x8xf32> to vector<1x8x8xf32>
    %cst_32 = arith.constant dense<0.000000e+00> : vector<1xf32>
    %84 = vector.multi_reduction <add>, %83, %cst_32 [1, 2] : vector<1x8x8xf32> to vector<1xf32>
    %85 = vector.shape_cast %84 : vector<1xf32> to vector<1x1x1xf32>
    %86 = vector.extract %85[0, 0, 0] : f32 from vector<1x1x1xf32>
    %87 = arith.mulf %76, %76 : vector<8x8xf32>
    %88 = vector.shape_cast %87 : vector<8x8xf32> to vector<1x8x8xf32>
    %cst_33 = arith.constant dense<0.000000e+00> : vector<1xf32>
    %89 = vector.multi_reduction <add>, %88, %cst_33 [1, 2] : vector<1x8x8xf32> to vector<1xf32>
    %90 = vector.shape_cast %89 : vector<1xf32> to vector<1x1x1xf32>
    %91 = vector.extract %90[0, 0, 0] : f32 from vector<1x1x1xf32>
    %92 = arith.mulf %86, %91 : f32
    %93 = math.rsqrt %92 : f32
    %94 = arith.mulf %81, %93 : f32
    %cst_34 = arith.constant 0.000000e+00 : f32
    %95 = arith.subf %cst_34, %94 : f32
    %c0_35 = arith.constant 0 : index
    %96 = memref.load %arg6[%c0_35] : memref<1xf32, #tpu.memory_space<smem>>
    memref.store %95, %arg6[%c0_35] : memref<1xf32, #tpu.memory_space<smem>>
    return
  }
}

</mosaic_0001>

<bundles_post_ra>
// kernel: tpu_custom_call.1
= control target key start
LH: loop header
LB: loop body
LE: loop exit
PB: predicated region body
PF: predicated region fallthrough
CT: control target
= control target key end

     0   :  { %12 = vsyncpa [#allocation3], 0  ;;  %s1138_s0 = inlined_call_operand.hbm [shape: f32[8,128], index: 0, kind: input, shape index: {}]   ;;  %s1139_s1 = inlined_call_operand.hbm [shape: f32[128,128], index: 1, kind: input, shape index: {}]   ;;  %s1140_s2 = inlined_call_operand.hbm [shape: f32[8,128], index: 2, kind: input, shape index: {}]   ;;  %s1141_s3 = inlined_call_operand.hbm [shape: f32[128,128], index: 3, kind: input, shape index: {}]   ;;  %s1142_s4 = inlined_call_operand.hbm [shape: f32[8,128], index: 4, kind: output, shape index: {0}]   ;;  %s1143_s5 = inlined_call_operand.hbm [shape: f32[8,128], index: 5, kind: output, shape index: {1}]   ;;  %s1144_s6 = inlined_call_operand.hbm [shape: f32[1], index: 6, kind: output, shape index: {2}]  }
   0x1   :  { %13 = vsyncpa [#allocation7], 0 }
   0x2   :  { %14 = vsyncpa [#allocation10], 0 }
   0x3   :  { %15 = vsyncpa [#allocation4], 0 }
   0x4   :  { %16 = vsyncpa [#allocation13], 0 }
   0x5   :  { %17 = vsyncpa [#allocation5], 0  ;;  %s970_s21 = smov [#allocation6]   ;;  %s816_s25 = scalar_lea.hbm %s1139_s1, 2048 }
   0x6   :  { %s33_s22 = sshll.u32 %s970_s21, 4  ;;  %p817_p0 = scmp.ne.s32.totalorder %s1139_s1, %s816_s25  ;;  %s34_s22 = int_to_ptr.vmem [resolvable:$true] %s33_s22 }
   0x7   :  { %p820_p1 = scmp.lt.u32.totalorder %s816_s25, %s1139_s1 }
   0x9   :  { %p822_p2 = pnand %p820_p1, %p817_p0 }
   0xb   :  { %825 = shalt.err (!%p822_p2)
}
   0xc   :  { %s826_s30 = scalar_lea.vmem %s34_s22, 2048  ;;  %p831_p4 = scmp.lt.s32.totalorder %s34_s22, %s34_s22 }
   0xd   :  { %p827_p3 = scmp.ne.s32.totalorder %s34_s22, %s826_s30  ;;  %p832_p5 = scmp.lt.s32.totalorder %s826_s30, %s826_s30 }
   0xf   :  { %p833_p6 = por %p832_p5, %p831_p4 }
  0x11   :  { %p834_p7 = pnand %p833_p6, %p827_p3 }
  0x13   :  { %837 = shalt.err (!%p834_p7)
}
  0x14   :  { %s971_s7 = smov 128   ;;  %s972_s8 = smov 8  }
  0x15   :  { %39 = dma.hbm_to_vmem [thread:$0]  %s1139_s1, 2048, %s34_s22, [#allocation7], %s971_s7, %s971_s7, %s972_s8  }
  0x16   :  { %s973_s11 = smov [#allocation2]   ;;  %s974_s13 = smov [#allocation8]  }
  0x17   :  { %s24_s12 = sshll.u32 %s973_s11, 4  ;;  %s46_s14 = sshll.u32 %s974_s13, 4  ;;  %s25_s12 = int_to_ptr.vmem [resolvable:$true] %s24_s12  ;;  %s47_s14 = int_to_ptr.vmem [resolvable:$true] %s46_s14 }
  0x18   :  { %s838_s17 = scalar_lea.hbm %s1138_s0, 128 }
  0x19   :  { %p839_p8 = scmp.ne.s32.totalorder %s1138_s0, %s838_s17  ;;  %p842_p9 = scmp.lt.u32.totalorder %s838_s17, %s1138_s0 }
  0x1b   :  { %p844_p10 = pnand %p842_p9, %p839_p8 }
  0x1d   :  { %847 = shalt.err (!%p844_p10)
}
  0x1e   :  { %s848_s1 = scalar_lea.vmem %s25_s12, 128  ;;  %p853_p12 = scmp.lt.s32.totalorder %s25_s12, %s25_s12 }
  0x1f   :  { %p849_p11 = scmp.ne.s32.totalorder %s25_s12, %s848_s1  ;;  %p854_p13 = scmp.lt.s32.totalorder %s848_s1, %s848_s1 }
  0x21   :  { %p855_p0 = por %p854_p13, %p853_p12 }
  0x23   :  { %p856_p1 = pnand %p855_p0, %p849_p11 }
  0x25   :  { %859 = shalt.err (!%p856_p1)
}
  0x26   :  { %27 = dma.hbm_to_vmem [thread:$0]  %s1138_s0, 128, %s25_s12, [#allocation3]  }
  0x27   :  { %s860_s26 = scalar_lea.hbm %s1140_s2, 128 }
  0x28   :  { %p861_p2 = scmp.ne.s32.totalorder %s1140_s2, %s860_s26  ;;  %p864_p3 = scmp.lt.u32.totalorder %s860_s26, %s1140_s2 }
  0x2a   :  { %p866_p4 = pnand %p864_p3, %p861_p2 }
  0x2c   :  { %869 = shalt.err (!%p866_p4)
}
  0x2d   :  { %s870_s9 = scalar_lea.vmem %s47_s14, 128  ;;  %p875_p6 = scmp.lt.s32.totalorder %s47_s14, %s47_s14 }
  0x2e   :  { %p871_p5 = scmp.ne.s32.totalorder %s47_s14, %s870_s9  ;;  %p876_p7 = scmp.lt.s32.totalorder %s870_s9, %s870_s9 }
  0x30   :  { %p877_p8 = por %p876_p7, %p875_p6 }
  0x32   :  { %p878_p9 = pnand %p877_p8, %p871_p5 }
  0x34   :  { %881 = shalt.err (!%p878_p9)
}
  0x35   :  { %49 = dma.hbm_to_vmem [thread:$0]  %s1140_s2, 128, %s47_s14, [#allocation7]  }
  0x36   :  { %s975_s11 = smov [#allocation9]   ;;  %s882_s16 = scalar_lea.hbm %s1141_s3, 2048 }
  0x37   :  { %s55_s12 = sshll.u32 %s975_s11, 4  ;;  %p883_p10 = scmp.ne.s32.totalorder %s1141_s3, %s882_s16  ;;  %s56_s12 = int_to_ptr.vmem [resolvable:$true] %s55_s12 }
  0x38   :  { %p886_p11 = scmp.lt.u32.totalorder %s882_s16, %s1141_s3 }
  0x3a   :  { %p888_p12 = pnand %p886_p11, %p883_p10 }
  0x3c   :  { %891 = shalt.err (!%p888_p12)
}
  0x3d   :  { %s892_s21 = scalar_lea.vmem %s56_s12, 2048  ;;  %p897_p0 = scmp.lt.s32.totalorder %s56_s12, %s56_s12 }
  0x3e   :  { %p893_p13 = scmp.ne.s32.totalorder %s56_s12, %s892_s21  ;;  %p898_p1 = scmp.lt.s32.totalorder %s892_s21, %s892_s21 }
  0x40   :  { %p899_p2 = por %p898_p1, %p897_p0 }
  0x42   :  { %p900_p3 = pnand %p899_p2, %p893_p13 }
  0x44   :  { %903 = shalt.err (!%p900_p3)
}
  0x45   :  { %61 = dma.hbm_to_vmem [thread:$0]  %s1141_s3, 2048, %s56_s12, [#allocation10], %s971_s7, %s971_s7, %s972_s8  }
  0x46   :  { %958 = dma.done.wait [#allocation3], 128  }
  0x47   :  { %959 = vsyncadd [#allocation3], 4294967168 }
  0x48   :  { %960 = dma.done.wait [#allocation7], 2176  }
  0x49   :  { %961 = vsyncadd [#allocation7], 4294965120 }
  0x4a   :  { %962 = dma.done.wait [#allocation10], 2048  }
  0x4b   :  { %963 = vsyncadd [#allocation10], 4294965248  ;;  %v976_v0 = vmov 0.0|0.0   ;;  %vm977_vm0 = vmmov 0   ;;  %v978_v1 = vmov 0.0   ;;  %v75_v2 = vld [vmem:[#allocation6] sm:$0xff]  ;;  %v231_v54 = vlaneseq }
  0x4c   :  { %738 = vmatprep.subr.bf16.mxu0 %v976_v0  ;;  %690 = vmatprep.mubr.msk.f32.mxu0 %vm977_vm0, %v978_v1  ;;  %v76_v3 = vld [vmem:[#allocation6 + $0x8] sm:$0xff]  ;;  %v77_v4 = vld [vmem:[#allocation6 + $0x10] sm:$0xff]  ;;  %v78_v6 = vld [vmem:[#allocation6 + $0x18] sm:$0xff]  ;;  %vm237_vm2 = vcmask 64512   ;;  %s979_s24 = smov [#allocation11]   ;;  %s980_s26 = smov [#allocation12]  }
  0x4d   :  { %693 = vmatprep.subr.mxu1 %v978_v1  ;;  %695 = vmatprep.mubr.msk.f32.mxu1 %vm977_vm0, %v978_v1  ;;  %v739_v5 = vpack.c.bf16 %v76_v3, %v75_v2  ;;  %v742_v7 = vpack.c.bf16 %v78_v6, %v77_v4  ;;  %v79_v8 = vld [vmem:[#allocation6 + $0x20] sm:$0xff]  ;;  %v80_v9 = vld [vmem:[#allocation6 + $0x28] sm:$0xff]  ;;  %v81_v11 = vld [vmem:[#allocation6 + $0x30] sm:$0xff]  ;;  %v232_v55 = vshrl.u32 %v231_v54, 7  ;;  %v234_v56 = vand.u32 127, %v231_v54  ;;  %s582_s25 = sshll.u32 %s979_s24, 4  ;;  %s583_s25 = int_to_ptr.vmem [resolvable:$true] %s582_s25 }
  0x4e   :  { %v745_v10 = vpack.c.bf16 %v80_v9, %v79_v8  ;;  %v82_v12 = vld [vmem:[#allocation6 + $0x38] sm:$0xff]  ;;  %v83_v14 = vld [vmem:[#allocation6 + $0x40] sm:$0xff]  ;;  %v84_v15 = vld [vmem:[#allocation6 + $0x48] sm:$0xff]  ;;  %s592_s27 = sshll.u32 %s980_s26, 4  ;;  %s904_s28 = scalar_lea.vmem %s583_s25, 128  ;;  %s593_s27 = int_to_ptr.vmem [resolvable:$true] %s592_s27 }
  0x4f   :  { %740 = vmatpush3.bf16.msra.mxu0 %v739_v5  ;;  %v748_v13 = vpack.c.bf16 %v82_v12, %v81_v11  ;;  %v751_v16 = vpack.c.bf16 %v84_v15, %v83_v14  ;;  %v85_v17 = vld [vmem:[#allocation6 + $0x50] sm:$0xff]  ;;  %v86_v18 = vld [vmem:[#allocation6 + $0x58] sm:$0xff]  ;;  %v87_v20 = vld [vmem:[#allocation6 + $0x60] sm:$0xff]  ;;  %vm235_vm1 = vcmp.eq.s32.totalorder %v232_v55, %v234_v56  ;;  %v277_v6 = vsub.s32 0, %v232_v55  ;;  %p905_p4 = scmp.ne.s32.totalorder %s583_s25, %s904_s28  ;;  %p909_p5 = scmp.lt.s32.totalorder %s583_s25, %s583_s25 }
  0x50   :  { %741 = vmatprep.subr.bf16.mxu0 %v976_v0  ;;  %v754_v19 = vpack.c.bf16 %v86_v18, %v85_v17  ;;  %v88_v21 = vld [vmem:[#allocation6 + $0x68] sm:$0xff]  ;;  %v89_v23 = vld [vmem:[#allocation6 + $0x70] sm:$0xff]  ;;  %v90_v24 = vld [vmem:[#allocation6 + $0x78] sm:$0xff]  ;;  %p910_p6 = scmp.lt.s32.totalorder %s904_s28, %s904_s28 }
  0x51   :  { %v757_v22 = vpack.c.bf16 %v88_v21, %v87_v20  ;;  %v760_v25 = vpack.c.bf16 %v90_v24, %v89_v23  ;;  %v74_v26 = vld [vmem:[#allocation2] sm:$0xff]  ;;  %v282_v27 = vld [vmem:[#allocation9] sm:$0xff]  ;;  %v283_v28 = vld [vmem:[#allocation9 + $0x8] sm:$0xff] }
  0x52   :  { %v763_v31 = vpack.c.bf16 %v283_v28, %v282_v27  ;;  %v284_v32 = vld [vmem:[#allocation9 + $0x10] sm:$0xff]  ;;  %v285_v33 = vld [vmem:[#allocation9 + $0x18] sm:$0xff]  ;;  %v286_v35 = vld [vmem:[#allocation9 + $0x20] sm:$0xff]  ;;  %p911_p7 = por %p910_p6, %p909_p5 }
  0x53   :  { %743 = vmatpush3.bf16.msra.mxu0 %v742_v7  ;;  %v766_v34 = vpack.c.bf16 %v285_v33, %v284_v32  ;;  %v287_v36 = vld [vmem:[#allocation9 + $0x28] sm:$0xff]  ;;  %v288_v38 = vld [vmem:[#allocation9 + $0x30] sm:$0xff]  ;;  %v289_v39 = vld [vmem:[#allocation9 + $0x38] sm:$0xff] }
  0x54   :  { %744 = vmatprep.subr.bf16.mxu0 %v976_v0  ;;  %v769_v37 = vpack.c.bf16 %v287_v36, %v286_v35  ;;  %v772_v40 = vpack.c.bf16 %v289_v39, %v288_v38  ;;  %v290_v41 = vld [vmem:[#allocation9 + $0x40] sm:$0xff]  ;;  %v291_v42 = vld [vmem:[#allocation9 + $0x48] sm:$0xff]  ;;  %v292_v44 = vld [vmem:[#allocation9 + $0x50] sm:$0xff]  ;;  %p912_p8 = pnand %p911_p7, %p905_p4 }
  0x55   :  { %v775_v43 = vpack.c.bf16 %v291_v42, %v290_v41  ;;  %v293_v45 = vld [vmem:[#allocation9 + $0x58] sm:$0xff]  ;;  %v294_v47 = vld [vmem:[#allocation9 + $0x60] sm:$0xff]  ;;  %v295_v48 = vld [vmem:[#allocation9 + $0x68] sm:$0xff] }
  0x56   :  { %v778_v46 = vpack.c.bf16 %v293_v45, %v292_v44  ;;  %v781_v49 = vpack.c.bf16 %v295_v48, %v294_v47  ;;  %v296_v50 = vld [vmem:[#allocation9 + $0x70] sm:$0xff]  ;;  %v297_v51 = vld [vmem:[#allocation9 + $0x78] sm:$0xff] }
  0x57   :  { %746 = vmatpush3.bf16.msra.mxu0 %v745_v10  ;;  %v784_v52 = vpack.c.bf16 %v297_v51, %v296_v50  ;;  %v281_v53 = vld [vmem:[#allocation8] sm:$0xff] }
  0x58   :  { %747 = vmatprep.subr.bf16.mxu0 %v976_v0 }
  0x5b   :  { %749 = vmatpush3.bf16.msra.mxu0 %v748_v13 }
  0x5c   :  { %750 = vmatprep.subr.bf16.mxu0 %v976_v0 }
  0x5f   :  { %752 = vmatpush3.bf16.msra.mxu0 %v751_v16 }
  0x60   :  { %753 = vmatprep.subr.bf16.mxu0 %v976_v0 }
  0x63   :  { %755 = vmatpush3.bf16.msra.mxu0 %v754_v19 }
  0x64   :  { %756 = vmatprep.subr.bf16.mxu0 %v976_v0 }
  0x67   :  { %758 = vmatpush3.bf16.msra.mxu0 %v757_v22 }
  0x68   :  { %759 = vmatprep.subr.bf16.mxu0 %v976_v0 }
  0x6b   :  { %761 = vmatpush3.bf16.msra.mxu0 %v760_v25 }
  0x6c   :  { %733 = vmatprep.subr.mxu0 %v978_v1 }
  0x6e   :  { %691 = vmatmul.mubr.f32.vlgmr.msra.gmra.mrb[0].mxu0 %v74_v26 }
  0x6f   :  { %735 = vmatprep.mubr.msk.f32.mxu0 %vm977_vm0, %v978_v1 }
 0x141   :  { %v157_v29 = vpop.f32.mrb[0].mxu0 }
 0x142   :  { %v692_v30 = vpop.f32.mrb[1].mxu0  ;;  %694 = vmatpush3.xpose.msra.mxu1 %v157_v29 }
 0x143   :  { %762 = vmatprep.subr.bf16.mxu1 %v976_v0 }
 0x145   :  { %696 = vmatmul.mubr.f32.vlgmr.msra.gmra.mrb[0].mxu1 %v157_v29 }
 0x146   :  { %764 = vmatpush3.bf16.msra.mxu1 %v763_v31  ;;  %730 = vmatprep.mubr.msk.f32.mxu1 %vm977_vm0, %v978_v1 }
 0x147   :  { %765 = vmatprep.subr.bf16.mxu1 %v976_v0 }
 0x14a   :  { %767 = vmatpush3.bf16.msra.mxu1 %v766_v34 }
 0x14b   :  { %768 = vmatprep.subr.bf16.mxu1 %v976_v0 }
 0x14e   :  { %770 = vmatpush3.bf16.msra.mxu1 %v769_v37 }
 0x14f   :  { %771 = vmatprep.subr.bf16.mxu1 %v976_v0 }
 0x152   :  { %773 = vmatpush3.bf16.msra.mxu1 %v772_v40 }
 0x153   :  { %774 = vmatprep.subr.bf16.mxu1 %v976_v0 }
 0x156   :  { %776 = vmatpush3.bf16.msra.mxu1 %v775_v43 }
 0x157   :  { %777 = vmatprep.subr.bf16.mxu1 %v976_v0 }
 0x15a   :  { %779 = vmatpush3.bf16.msra.mxu1 %v778_v46 }
 0x15b   :  { %780 = vmatprep.subr.bf16.mxu1 %v976_v0 }
 0x15e   :  { %782 = vmatpush3.bf16.msra.mxu1 %v781_v49 }
 0x15f   :  { %783 = vmatprep.subr.bf16.mxu1 %v976_v0 }
 0x162   :  { %785 = vmatpush3.bf16.msra.mxu1 %v784_v52 }
 0x165   :  { %731 = vmatmul.mubr.f32.vlgmr.msra.gmra.mrb[2].mxu1 %v281_v53 }
 0x218   :  { %v227_v57 = vpop.f32.mrb[0].mxu1 }
 0x219   :  { %v697_v58 = vpop.f32.mrb[1].mxu1  ;;  %v236_v59 = vsel %vm235_vm1, %v227_v57, 0.0 }
 0x21a   :  { %v238_v60 = vsel %vm237_vm2, %v236_v59, 0.0 }
 0x21b   :  { %239 = vadd.xlane.f32.xlu0 %v238_v60 }
 0x238   :  { %v364_v61 = vpop.f32.mrb[2].mxu1 }
 0x239   :  { %v732_v62 = vpop.f32.mrb[3].mxu1  ;;  %734 = vmatpush3.xpose.msra.mxu0 %v364_v61 }
 0x23c   :  { %736 = vmatmul.mubr.f32.vlgmr.msra.gmra.mrb[2].mxu0 %v364_v61 }
 0x2a8   :  { %v240_v63 = vpop.xlane.xlu0 %239 }
 0x2a9   :  { %v241_v0 = vmax.f32 %v240_v63, 1e-24 }
 0x2ab   :  { %810 = vrsqrt.f32 %v241_v0 }
 0x2b5   :  { %v811_v1 = vpop.eup %810 }
 0x2b6   :  { %243 = vxpose.xlu1.b32.start.end [1/1] (short) (narrow) %v811_v1, 8 }
 0x30f   :  { %v434_v2 = vpop.f32.mrb[2].mxu0 }
 0x310   :  { %v737_v3 = vpop.f32.mrb[3].mxu0  ;;  %v438_v4 = vsel %vm235_vm1, %v434_v2, 0.0 }
 0x311   :  { %v439_v5 = vsel %vm237_vm2, %v438_v4, 0.0 }
 0x312   :  { %440 = vadd.xlane.f32.xlu0 %v439_v5 }
 0x336   :  { %v259_v7 = vpop.trf.xlu1 }
 0x337   :  { %v278_v8 = vrot.slane %v259_v7, %v277_v6 }
 0x339   :  { %v279_v9 = vmul.f32 %v811_v1, %v278_v8 }
 0x33b   :  { %v280_v10 = vmul.f32 %v279_v9, %v227_v57 }
 0x33d   :  { %v482_v11 = vsel %vm237_vm2, %v280_v10, 0.0 }
 0x33e   :  { %v486_v12 = vrot.slane %v482_v11, 4  ;;  %483 = vst [vmem:[#allocation11] sm:$0xff] %v482_v11 }
 0x340   :  { %v487_v13 = vadd.f32 %v486_v12, %v482_v11 }
 0x342   :  { %v488_v14 = vrot.slane %v487_v13, 2 }
 0x344   :  { %v489_v15 = vadd.f32 %v488_v14, %v487_v13 }
 0x346   :  { %v490_v16 = vrot.slane %v489_v15, 1 }
 0x348   :  { %v491_v17 = vadd.f32 %v490_v16, %v489_v15 }
 0x34a   :  { %v493_v18 = vmul.f32 0.125, %v491_v17 }
 0x34c   :  { %v494_v19 = vsel %vm237_vm2, %v493_v18, 0.0 }
 0x34d   :  { %495 = vadd.xlane.f32.xlu0 %v494_v19 }
 0x39f   :  { %v441_v20 = vpop.xlane.xlu0 %440 }
 0x3a0   :  { %v442_v21 = vmax.f32 %v441_v20, 1e-24 }
 0x3a2   :  { %812 = vrsqrt.f32 %v442_v21 }
 0x3ac   :  { %v813_v22 = vpop.eup %812 }
 0x3ad   :  { %444 = vxpose.xlu1.b32.start.end [1/1] (short) (narrow) %v813_v22, 8 }
 0x3da   :  { %v496_v23 = vpop.xlane.xlu0 %495 }
 0x3db   :  { %786 = vpush %v496_v23 }
 0x40c   :  { %s787_s3 = spop %786 }
 0x40d   :  { %s500_s7 = smul.f32 0.125, %s787_s3 }
 0x40f   :  { %s503_s8 = smul.f32 0.5, %s500_s7 }
 0x411   :  { %v504_v24 = vstv %s503_s8 }
 0x412   :  { %v505_v25 = vsub.f32 %v493_v18, %v504_v24 }
 0x414   :  { %507 = vbcast.lane.b32.xlu0 %v505_v25, 256 }
 0x42d   :  { %v460_v26 = vpop.trf.xlu1 }
 0x42e   :  { %v479_v27 = vrot.slane %v460_v26, %v277_v6 }
 0x430   :  { %v480_v28 = vmul.f32 %v813_v22, %v479_v27 }
 0x432   :  { %v481_v29 = vmul.f32 %v480_v28, %v434_v2 }
 0x434   :  { %v484_v30 = vsel %vm237_vm2, %v481_v29, 0.0 }
 0x435   :  { %v511_v31 = vrot.slane %v484_v30, 4  ;;  %485 = vst [vmem:[#allocation12] sm:$0xff] %v484_v30 }
 0x437   :  { %v512_v32 = vadd.f32 %v511_v31, %v484_v30 }
 0x439   :  { %v513_v33 = vrot.slane %v512_v32, 2 }
 0x43b   :  { %v514_v34 = vadd.f32 %v513_v33, %v512_v32 }
 0x43d   :  { %v515_v35 = vrot.slane %v514_v34, 1 }
 0x43f   :  { %v516_v36 = vadd.f32 %v515_v35, %v514_v34 }
 0x441   :  { %v517_v37 = vmul.f32 0.125, %v516_v36 }
 0x443   :  { %v518_v38 = vsel %vm237_vm2, %v517_v37, 0.0 }
 0x444   :  { %519 = vadd.xlane.f32.xlu1 %v518_v38 }
 0x486   :  { %v508_v39 = vpop.permute.xlu0 %507 }
 0x487   :  { %v509_v40 = vsub.f32 %v280_v10, %v508_v39 }
 0x489   :  { %v510_v41 = vsub.f32 %v509_v40, %v505_v25 }
 0x48b   :  { %v546_v42 = vmul.f32 %v510_v41, %v510_v41 }
 0x48d   :  { %v547_v43 = vsel %vm237_vm2, %v546_v42, 0.0 }
 0x48e   :  { %548 = vadd.xlane.f32.xlu1 %v547_v43 }
 0x4d1   :  { %v520_v44 = vpop.xlane.xlu1 %519 }
 0x4d2   :  { %788 = vpush %v520_v44 }
 0x503   :  { %s789_s1 = spop %788 }
 0x504   :  { %s524_s22 = smul.f32 0.125, %s789_s1 }
 0x506   :  { %s527_s23 = smul.f32 0.5, %s524_s22 }
 0x508   :  { %v528_v45 = vstv %s527_s23 }
 0x509   :  { %v529_v46 = vsub.f32 %v517_v37, %v528_v45 }
 0x50b   :  { %531 = vbcast.lane.b32.xlu0 %v529_v46, 256 }
 0x51b   :  { %v549_v54 = vpop.xlane.xlu1 %548 }
 0x51c   :  { %v550_v55 = vrot.slane %v549_v54, 4 }
 0x51e   :  { %v551_v56 = vadd.f32 %v550_v55, %v549_v54 }
 0x520   :  { %v552_v57 = vrot.slane %v551_v56, 2 }
 0x522   :  { %v553_v0 = vadd.f32 %v552_v57, %v551_v56 }
 0x57d   :  { %v532_v47 = vpop.permute.xlu0 %531 }
 0x57e   :  { %v533_v48 = vsub.f32 %v481_v29, %v532_v47 }
 0x580   :  { %v534_v49 = vsub.f32 %v533_v48, %v529_v46 }
 0x582   :  { %v557_v50 = vmul.f32 %v534_v49, %v534_v49  ;;  %v535_v51 = vmul.f32 %v534_v49, %v510_v41 }
 0x584   :  { %v558_v52 = vsel %vm237_vm2, %v557_v50, 0.0  ;;  %v536_v53 = vsel %vm237_vm2, %v535_v51, 0.0 }
 0x585   :  { %559 = vadd.xlane.f32.xlu1 %v558_v52  ;;  %537 = vadd.xlane.f32.xlu0 %v536_v53 }
 0x612   :  { %v560_v58 = vpop.xlane.xlu1 %559  ;;  %v538_v59 = vpop.xlane.xlu0 %537 }
 0x613   :  { %v561_v60 = vrot.slane %v560_v58, 4  ;;  %v539_v61 = vrot.slane %v538_v59, 4 }
 0x615   :  { %v562_v62 = vadd.f32 %v561_v60, %v560_v58  ;;  %v540_v63 = vadd.f32 %v539_v61, %v538_v59 }
 0x617   :  { %v563_v1 = vrot.slane %v562_v62, 2  ;;  %v541_v2 = vrot.slane %v540_v63, 2 }
 0x618   :  { %915 = shalt.err (!%p912_p8)
}
 0x619   :  { %s916_s9 = scalar_lea.hbm %s1142_s4, 128 }
 0x61a   :  { %p917_p9 = scmp.ne.s32.totalorder %s1142_s4, %s916_s9  ;;  %p920_p10 = scmp.lt.u32.totalorder %s916_s9, %s1142_s4 }
 0x61c   :  { %p922_p11 = pnand %p920_p10, %p917_p9 }
 0x61e   :  { %925 = shalt.err (!%p922_p11)
}
 0x61f   :  { %585 = dma.vmem_to_hbm [thread:$0]  %s583_s25, 128, %s1142_s4, [#allocation4]   ;;  %v564_v3 = vadd.f32 %v563_v1, %v562_v62  ;;  %v542_v4 = vadd.f32 %v541_v2, %v540_v63 }
 0x620   :  { %s926_s16 = scalar_lea.vmem %s593_s27, 128  ;;  %p931_p13 = scmp.lt.s32.totalorder %s593_s27, %s593_s27 }
 0x621   :  { %p927_p12 = scmp.ne.s32.totalorder %s593_s27, %s926_s16  ;;  %p932_p0 = scmp.lt.s32.totalorder %s926_s16, %s926_s16 }
 0x623   :  { %p933_p1 = por %p932_p0, %p931_p13 }
 0x625   :  { %p934_p2 = pnand %p933_p1, %p927_p12 }
 0x627   :  { %937 = shalt.err (!%p934_p2)
}
 0x628   :  { %s938_s19 = scalar_lea.hbm %s1143_s5, 128 }
 0x629   :  { %p939_p3 = scmp.ne.s32.totalorder %s1143_s5, %s938_s19  ;;  %p942_p4 = scmp.lt.u32.totalorder %s938_s19, %s1143_s5 }
 0x62b   :  { %p944_p5 = pnand %p942_p4, %p939_p3 }
 0x62d   :  { %947 = shalt.err (!%p944_p5)
}
 0x62e   :  { %595 = dma.vmem_to_hbm [thread:$0]  %s593_s27, 128, %s1143_s5, [#allocation13]   ;;  %v554_v5 = vrot.slane %v553_v0, 1  ;;  %v543_v6 = vrot.slane %v542_v4, 1  ;;  %v565_v7 = vrot.slane %v564_v3, 1 }
 0x62f   :  { %s948_s27 = scalar_lea.hbm %s1144_s6, 16 }
 0x630   :  { %v544_v8 = vadd.f32 %v543_v6, %v542_v4  ;;  %v566_v9 = vadd.f32 %v565_v7, %v564_v3  ;;  %v555_v10 = vadd.f32 %v554_v5, %v553_v0  ;;  %p949_p6 = scmp.ne.s32.totalorder %s1144_s6, %s948_s27  ;;  %p952_p7 = scmp.lt.u32.totalorder %s948_s27, %s1144_s6 }
 0x632   :  { %790 = vpush %v544_v8  ;;  %p954_p8 = pnand %p952_p7, %p949_p6 }
 0x633   :  { %792 = vpush %v555_v10 }
 0x634   :  { %794 = vpush %v566_v9 }
 0x663   :  { %s791_s7 = spop %790 }
 0x664   :  { %s793_s8 = spop %792 }
 0x665   :  { %s795_s1 = spop %794 }
 0x666   :  { %s568_s22 = smul.f32 %s795_s1, %s793_s8 }
 0x668   :  { %v569_v11 = vstv %s568_s22 }
 0x669   :  { %814 = vrsqrt.f32 %v569_v11 }
 0x673   :  { %v815_v12 = vpop.eup %814 }
 0x674   :  { %796 = vpush %v815_v12 }
 0x6a5   :  { %s797_s23 = spop %796 }
 0x6a6   :  { %s572_s24 = smul.f32 %s797_s23, %s791_s7 }
 0x6a8   :  { %s573_s5 = ssub.f32 0.0, %s572_s24 }
 0x6aa   :  { %575 = sst [smem:[#allocation14]] %s573_s5 }
 0x6ab   :  { %957 = shalt.err (!%p954_p8)
}
 0x6ac   :  { %s981_s0 = smov [#allocation14]  }
 0x6ad   :  { %603 = dma.smem_to_hbm %s981_s0, 16, %s1144_s6, [#allocation5]  }
 0x6ae   :  { %964 = dma.done.wait [#allocation4], 128  }
 0x6af   :  { %965 = vsyncadd [#allocation4], 4294967168 }
 0x6b0   :  { %966 = dma.done.wait [#allocation13], 128  }
 0x6b1   :  { %967 = vsyncadd [#allocation13], 4294967168 }
 0x6b2   :  { %968 = dma.done.wait [#allocation5], 16  }
 0x6b3   :  { %969 = vsyncadd [#allocation5], 4294967280 }
 0x6b4   :  { %613 = sfence }
 0x6b5   :  { %614 = vsyncpa [#allocation3], 1 }
 0x6b6   :  { %615 = vsyncpa [#allocation7], 1 }
 0x6b7   :  { %616 = vsyncpa [#allocation10], 1 }
 0x6b8   :  { %617 = vsyncpa [#allocation4], 1 }
 0x6b9   :  { %618 = vsyncpa [#allocation13], 1 }
 0x6ba   :  { %619 = vsyncpa [#allocation5], 1 }

</bundles_post_ra>
